<compile_context>
chip_gen: v7x
topology: tpu7x:2x2x1
jax: 0.10.0
libtpu: 0.0.40
codegen_flags: <defaults>
</compile_context>

<pallas_src>
import functools

import jax
import jax.numpy as jnp
from jax.experimental import pallas as pl
from jax.experimental.pallas import tpu as pltpu

# Sizes implied by the module:
#   dim0 must equal 1 + sum([2, 4]) = 7, dim2 must equal 2 + 4 = 6
D0 = 7           # batch-like dim (split into [1, 6])
D1 = 4           # free dim (cancels in the split-size expression)
D2 = 6           # dim split into [2, 4]
D3 = 16          # trailing free dim

BATCH_KEEP = 1           # batch_split_size
CH_SPLIT = (2, 4)        # channels_split_size
CH_KEEP = CH_SPLIT[0]
CAT_REPEAT = 3           # cat((x, x, x), dim=2)


def _model_kernel(x_ref, o_ref, *, lanes_keep):
    # x_ref: (1, d1, d2*d3)  -- batch-0 slab (dim-0 split fused into the BlockSpec DMA)
    # o_ref: (d1, CAT_REPEAT, CH_KEEP*d3)
    z = x_ref[0, :, 0:lanes_keep]                 # dim-2 split: static VMEM slice -> (d1, CH_KEEP*d3)
    # 2 * softmax(z/2, axis=0) over a size-1 axis == z*0 + 2 (NaN for NaN/Inf inputs).
    y2 = (z * 0.0 + 2.0).astype(o_ref.dtype)      # (d1, CH_KEEP*d3)
    # cat((y, y, y), dim=2): replicate along a new axis via sublane broadcast;
    # one full-ref store, no lane-axis concatenate.
    o_ref[...] = jnp.broadcast_to(y2[:, None, :], o_ref.shape)


@jax.jit
def model_forward(x):
    d0, d1, d2, d3 = x.shape
    assert d0 == BATCH_KEEP + sum(CH_SPLIT), "dim0 incompatible with split sizes"
    assert d2 == sum(CH_SPLIT), "dim2 incompatible with split sizes"

    lanes_in = d2 * d3
    lanes_keep = CH_KEEP * d3

    # Free row-major regroup (no data movement): (d0, d1, d2, d3) -> (d0, d1, d2*d3).
    x3 = x.reshape(d0, d1, lanes_in)

    out3 = pl.pallas_call(
        functools.partial(_model_kernel, lanes_keep=lanes_keep),
        out_shape=jax.ShapeDtypeStruct((d1, CAT_REPEAT, lanes_keep), x.dtype),
        grid=(1,),
        # Only the batch-0 slab is DMA'd (block covers rows [0:1] of dim 0);
        # the last two block dims equal the full array dims.
        in_specs=[pl.BlockSpec((1, d1, lanes_in), lambda i: (0, 0, 0))],
        out_specs=pl.BlockSpec((d1, CAT_REPEAT, lanes_keep), lambda i: (0, 0, 0)),
        compiler_params=pltpu.CompilerParams(dimension_semantics=("arbitrary",)),
        cost_estimate=pl.CostEstimate(
            flops=2 * d1 * CAT_REPEAT * lanes_keep,
            transcendentals=0,
            bytes_accessed=(d1 * lanes_in + d1 * CAT_REPEAT * lanes_keep)
            * x.dtype.itemsize,
        ),
    )(x3)

    # Free row-major regroup back to the PyTorch output shape (1, d1, 6, d3):
    # flat order d1*96 + rep*32 + ch*16 + d3 == d1*96 + (rep*2+ch)*16 + d3.
    return out3.reshape(BATCH_KEEP, d1, CAT_REPEAT * CH_KEEP, d3)


def _reference(x):
    # Pure-JAX reference mirroring the PyTorch forward exactly.
    a = x[:BATCH_KEEP]                       # split dim 0 -> [1, 6], keep first
    a = a[:, :, :CH_KEEP, :]                 # split dim 2 -> [2, 4], keep first
    a = jax.nn.softmax(a / 2.0, axis=0)      # Softmax(dim=0)
    a = jnp.concatenate((a, a, a), axis=2)   # cat dim=2
    return a + a


if __name__ == "__main__":
    key = jax.random.PRNGKey(0)
    x = jax.random.normal(key, (D0, D1, D2, D3), dtype=jnp.float32)

    out = model_forward(x)
    out = jax.block_until_ready(out)

    ref = _reference(x)
    assert out.shape == ref.shape, (out.shape, ref.shape)
    assert jnp.allclose(out, ref, atol=1e-5, rtol=1e-5), "mismatch vs reference"

    print("KERNEL_OK")
</pallas_src>

<mosaic_0001>
module attributes {stable_mosaic.version = 11 : i64} {
  func.func @_model_kernel(%arg0: i32, %arg1: memref<1x4x96xf32, #tpu.memory_space<vmem>>, %arg2: memref<4x3x32xf32, #tpu.memory_space<vmem>>) attributes {dimension_semantics = [#tpu.dimension_semantics<arbitrary>], iteration_bounds = array<i64: 1>, scalar_prefetch = 0 : i64, scratch_operands = 0 : i64, tpu.core_type = #tpu.core_type<tc>, window_params = [{transform_indices = @transform_0, window_bounds = array<i64: 1, 4, 96>}, {pipeline_mode = #tpu.pipeline_mode<synchronous>, transform_indices = @transform_1, window_bounds = array<i64: 4, 3, 32>}]} {
    %c0 = arith.constant 0 : index
    %c0_0 = arith.constant 0 : index
    %c0_1 = arith.constant 0 : index
    %0 = vector.load %arg1[%c0, %c0_0, %c0_1] : memref<1x4x96xf32, #tpu.memory_space<vmem>>, vector<1x4x32xf32>
    %1 = vector.shape_cast %0 : vector<1x4x32xf32> to vector<4x32xf32>
    %cst = arith.constant 0.000000e+00 : f32
    %2 = vector.broadcast %cst : f32 to vector<4x32xf32>
    %3 = arith.mulf %1, %2 : vector<4x32xf32>
    %cst_2 = arith.constant 2.000000e+00 : f32
    %4 = vector.broadcast %cst_2 : f32 to vector<4x32xf32>
    %5 = arith.addf %3, %4 : vector<4x32xf32>
    %6 = vector.shape_cast %5 : vector<4x32xf32> to vector<4x1x32xf32>
    %7 = vector.shape_cast %6 : vector<4x1x32xf32> to vector<4x1x32xf32>
    %8 = vector.broadcast %7 : vector<4x1x32xf32> to vector<4x3x32xf32>
    %c0_3 = arith.constant 0 : index
    %c0_4 = arith.constant 0 : index
    %c0_5 = arith.constant 0 : index
    %9 = vector.load %arg2[%c0_3, %c0_4, %c0_5] : memref<4x3x32xf32, #tpu.memory_space<vmem>>, vector<4x3x32xf32>
    tpu.vector_store %arg2[%c0_3, %c0_4, %c0_5], %8 {strides = array<i32>} : memref<4x3x32xf32, #tpu.memory_space<vmem>>, vector<4x3x32xf32>,
    return
  }
  func.func @transform_0(%arg0: i32) -> (i32, i32, i32) {
    %c0_i32 = arith.constant 0 : i32
    %c0_i32_0 = arith.constant 0 : i32
    %c0_i32_1 = arith.constant 0 : i32
    %c0_i32_2 = arith.constant 0 : i32
    return %c0_i32, %c0_i32_0, %c0_i32_1 : i32, i32, i32
  }
  func.func @transform_1(%arg0: i32) -> (i32, i32, i32) {
    %c0_i32 = arith.constant 0 : i32
    %c0_i32_0 = arith.constant 0 : i32
    %c0_i32_1 = arith.constant 0 : i32
    %c0_i32_2 = arith.constant 0 : i32
    return %c0_i32, %c0_i32_0, %c0_i32_1 : i32, i32, i32
  }
}

</mosaic_0001>

<bundles_post_ra>
// kernel: model_forward.1
= control target key start
LH: loop header
LB: loop body
LE: loop exit
PB: predicated region body
PF: predicated region fallthrough
CT: control target
= control target key end

     0   :  { %v15_v0 = vlaneseq  ;;  %v66_v2 = vmov 1966171168   ;;  %vm56_vm0 = vcmask 256000   ;;  %s92_s0 = inlined_call_operand.vmem [shape: f32[7,4,96], index: 0, kind: input, shape index: {}]   ;;  %s93_s1 = inlined_call_operand.vmem [shape: f32[4,3,32], index: 1, kind: output, shape index: {}]  }
   0x1   :  { %v8_v1 = vld [vmem:[%s92_s0] sm:$0xf]  ;;  %v13_v3 = vunpack.c.l.s4 %v66_v2 }
   0x2   :  { %v9_v4 = vmul.f32 0.0, %v8_v1  ;;  %v16_v5 = vshrl.u32 %v15_v0, 7 }
   0x3   :  { %v14_v6 = vunpack.c.0.s8 %v13_v3 }
   0x4   :  { %v10_v7 = vadd.f32 2.0, %v9_v4  ;;  %v38_v10 = vsub.s32 0, %v16_v5 }
   0x5   :  { %v17_v8 = vsub.s32 %v14_v6, %v16_v5 }
   0x7   :  { %v18_v9 = vrot.slane %v10_v7, %v17_v8 }
   0x9   :  { %v26_v11 = vrot.slane %v18_v9, %v17_v8  ;;  %v19_v12 = vcombine.high %v18_v9, %v18_v9 }
   0xb   :  { %v39_v13 = vrot.slane %v26_v11, %v38_v10  ;;  %v33_v14 = vrot.slane %v19_v12, %v17_v8  ;;  %v34_v15 = vcombine.high %v26_v11, %v26_v11 }
   0xd   :  { %57 = vst.msk [vmem:[%s93_s1] sm:$0x7] %vm56_vm0, %v39_v13  ;;  %v43_v16 = vrot.slane %v33_v14, %v38_v10  ;;  %v47_v17 = vrot.slane %v34_v15, %v38_v10  ;;  %v35_v18 = vcombine.high %v33_v14, %v33_v14 }
   0xf   :  { %58 = vst.msk [vmem:[%s93_s1 + $0x4] sm:$0x7] %vm56_vm0, %v43_v16  ;;  %59 = vst.msk [vmem:[%s93_s1 + $0x8] sm:$0x7] %vm56_vm0, %v47_v17  ;;  %v51_v19 = vrot.slane %v35_v18, %v38_v10 }
  0x11   :  { %60 = vst.msk [vmem:[%s93_s1 + $0xc] sm:$0x7] %vm56_vm0, %v51_v19 }

</bundles_post_ra>
